<compile_context>
chip_gen: v5e
topology: v5e:2x2
jax: 0.10.0
libtpu: 0.0.40
codegen_flags: <defaults>
</compile_context>

<pallas_src>
import jax
import jax.numpy as jnp
from jax.experimental import pallas as pl
from jax.experimental.pallas import tpu as pltpu


def _mlp_kernel(x_ref, w1_ref, b1_ref, w2_ref, b2_ref, w3_ref, b3_ref, o_ref):
    # Cast x to the weight dtype inside the kernel (no-op in the f32 path;
    # avoids an extra wrapper-side HBM read+write pass in the bf16 path).
    x = x_ref[...].astype(w1_ref.dtype)
    # Hidden layer 1: Linear + ReLU  (f32 MXU accumulation, f32 elementwise)
    h1 = jnp.dot(x, w1_ref[...], preferred_element_type=jnp.float32)
    h1 = jnp.maximum(h1 + b1_ref[...], 0.0)
    # Hidden layer 2: Linear + ReLU
    h2 = jnp.dot(h1.astype(w2_ref.dtype), w2_ref[...],
                 preferred_element_type=jnp.float32)
    h2 = jnp.maximum(h2 + b2_ref[...], 0.0)
    # Output layer: Linear (no activation — raw function parameters).
    out = jnp.dot(h2.astype(w3_ref.dtype), w3_ref[...],
                  preferred_element_type=jnp.float32)
    o_ref[...] = (out + b3_ref[...]).astype(o_ref.dtype)


def function_param_net_forward(x, params, output_dims, has_bias=True,
                               block_b=2048, use_bf16_matmul=False,
                               out_dtype=jnp.float32):
    """Fused MLP Pallas kernel; returns (B, output_dims, output_dims[+1])."""
    w1, b1, w2, b2, w3, b3 = params
    B, in_dims = x.shape
    fn_dims = w3.shape[1]
    bias_dim = 1 if has_bias else 0
    if fn_dims != output_dims * (output_dims + bias_dim):
        raise ValueError(
            f"fn_dims={fn_dims} incompatible with output_dims={output_dims}, "
            f"bias={has_bias}")

    if use_bf16_matmul:
        # Only the tiny, VMEM-resident weights are cast in the wrapper; x is
        # cast inside the kernel so its HBM stream stays a single f32 read.
        w1 = w1.astype(jnp.bfloat16)
        w2 = w2.astype(jnp.bfloat16)
        w3 = w3.astype(jnp.bfloat16)

    # Batch tile: either the whole batch (full-dim block, always legal) or a
    # multiple-of-8 tile; the ragged last grid block is masked by Pallas.
    if B <= block_b:
        tb = B
    else:
        tb = (block_b // 8) * 8
    grid = (pl.cdiv(B, tb),)

    vmem = pltpu.MemorySpace.VMEM
    resident = lambda arr: pl.BlockSpec(arr.shape, lambda i: (0, 0),
                                        memory_space=vmem)

    flat = pl.pallas_call(
        _mlp_kernel,
        out_shape=jax.ShapeDtypeStruct((B, fn_dims), out_dtype),
        grid=grid,
        in_specs=[
            pl.BlockSpec((tb, in_dims), lambda i: (i, 0), memory_space=vmem),
            resident(w1), resident(b1),
            resident(w2), resident(b2),
            resident(w3), resident(b3),
        ],
        out_specs=pl.BlockSpec((tb, fn_dims), lambda i: (i, 0),
                               memory_space=vmem),
        compiler_params=pltpu.CompilerParams(
            dimension_semantics=("parallel",)),
    )(x, w1, b1, w2, b2, w3, b3)

    # The module's .view() reshape (pure JAX glue, no extra HBM pass needed
    # beyond metadata).
    return flat.reshape(-1, output_dims, output_dims + bias_dim)


def init_params(key, input_dims, hidden, fn_dims):
    """Deterministic synthetic weights for the MultiLayerNN stack."""
    ks = jax.random.split(key, 6)
    scale = 0.1
    w1 = scale * jax.random.normal(ks[0], (input_dims, hidden), jnp.float32)
    b1 = scale * jax.random.normal(ks[1], (1, hidden), jnp.float32)
    w2 = scale * jax.random.normal(ks[2], (hidden, hidden), jnp.float32)
    b2 = scale * jax.random.normal(ks[3], (1, hidden), jnp.float32)
    w3 = scale * jax.random.normal(ks[4], (hidden, fn_dims), jnp.float32)
    b3 = scale * jax.random.normal(ks[5], (1, fn_dims), jnp.float32)
    return w1, b1, w2, b2, w3, b3


if __name__ == "__main__":
    # Small, module-consistent sizes.
    batch = 8
    input_dims = 16     # conditioning input size
    output_dims = 4     # dimension of the linear flow transform
    hidden = 32         # MultiLayerNN hidden width
    has_bias = True
    fn_dims = output_dims ** 2 + (output_dims if has_bias else 0)  # 20

    key = jax.random.PRNGKey(0)
    kx, kp = jax.random.split(key)
    x = jax.random.normal(kx, (batch, input_dims), jnp.float32)
    params = init_params(kp, input_dims, hidden, fn_dims)

    out = function_param_net_forward(x, params, output_dims, has_bias)
    out = jax.block_until_ready(out)

    # Pure-JAX reference check of the fused kernel (f32 path).
    w1, b1, w2, b2, w3, b3 = params
    h1 = jnp.maximum(x @ w1 + b1, 0.0)
    h2 = jnp.maximum(h1 @ w2 + b2, 0.0)
    ref = (h2 @ w3 + b3).reshape(-1, output_dims, output_dims + 1)
    assert out.shape == (batch, output_dims, output_dims + 1), out.shape
    assert jnp.allclose(out, ref, atol=1e-5, rtol=1e-5)

    # Exercise the ragged-grid path: non-tile-aligned batch with a small tile
    # so the last block is partial (validates Pallas masking of the boundary).
    big_b = 1000
    xb = jax.random.normal(jax.random.PRNGKey(1), (big_b, input_dims), jnp.float32)
    out_b = jax.block_until_ready(
        function_param_net_forward(xb, params, output_dims, has_bias,
                                   block_b=256))
    h1b = jnp.maximum(xb @ w1 + b1, 0.0)
    h2b = jnp.maximum(h1b @ w2 + b2, 0.0)
    ref_b = (h2b @ w3 + b3).reshape(-1, output_dims, output_dims + 1)
    assert out_b.shape == (big_b, output_dims, output_dims + 1), out_b.shape
    assert jnp.allclose(out_b, ref_b, atol=1e-4, rtol=1e-4)

    # Single-block large-tile path (default block_b=2048 covers B=1000 whole).
    out_c = jax.block_until_ready(
        function_param_net_forward(xb, params, output_dims, has_bias))
    assert jnp.allclose(out_c, ref_b, atol=1e-4, rtol=1e-4)

    print("KERNEL_OK")
</pallas_src>

<mosaic_0001>
module attributes {stable_mosaic.version = 11 : i64} {
  func.func @_mlp_kernel(%arg0: i32, %arg1: memref<8x16xf32, #tpu.memory_space<vmem>>, %arg2: memref<16x32xf32, #tpu.memory_space<vmem>>, %arg3: memref<1x32xf32, #tpu.memory_space<vmem>>, %arg4: memref<32x32xf32, #tpu.memory_space<vmem>>, %arg5: memref<1x32xf32, #tpu.memory_space<vmem>>, %arg6: memref<32x20xf32, #tpu.memory_space<vmem>>, %arg7: memref<1x20xf32, #tpu.memory_space<vmem>>, %arg8: memref<8x20xf32, #tpu.memory_space<vmem>>) attributes {dimension_semantics = [#tpu.dimension_semantics<parallel>], iteration_bounds = array<i64: 1>, scalar_prefetch = 0 : i64, scratch_operands = 0 : i64, tpu.core_type = #tpu.core_type<tc>, window_params = [{transform_indices = @transform_0, window_bounds = array<i64: 8, 16>}, {pipeline_mode = #tpu.pipeline_mode<synchronous>, transform_indices = @transform_1, window_bounds = array<i64: 16, 32>}, {pipeline_mode = #tpu.pipeline_mode<synchronous>, transform_indices = @transform_2, window_bounds = array<i64: 1, 32>}, {pipeline_mode = #tpu.pipeline_mode<synchronous>, transform_indices = @transform_3, window_bounds = array<i64: 32, 32>}, {pipeline_mode = #tpu.pipeline_mode<synchronous>, transform_indices = @transform_4, window_bounds = array<i64: 1, 32>}, {pipeline_mode = #tpu.pipeline_mode<synchronous>, transform_indices = @transform_5, window_bounds = array<i64: 32, 20>}, {pipeline_mode = #tpu.pipeline_mode<synchronous>, transform_indices = @transform_6, window_bounds = array<i64: 1, 20>}, {transform_indices = @transform_7, window_bounds = array<i64: 8, 20>}]} {
    %c0 = arith.constant 0 : index
    %c0_0 = arith.constant 0 : index
    %0 = vector.load %arg1[%c0, %c0_0] : memref<8x16xf32, #tpu.memory_space<vmem>>, vector<8x16xf32>
    %c0_1 = arith.constant 0 : index
    %c0_2 = arith.constant 0 : index
    %1 = vector.load %arg2[%c0_1, %c0_2] : memref<16x32xf32, #tpu.memory_space<vmem>>, vector<16x32xf32>
    %cst = arith.constant dense<0.000000e+00> : vector<8x32xf32>
    %2 = tpu.matmul %0, %1, %cst {dimension_numbers = #tpu.dot_dimension_numbers<[1], [0], [0], [1], [0, 0, 1, 1], [], []>} : vector<8x16xf32>, vector<16x32xf32>, vector<8x32xf32> -> vector<8x32xf32>
    %c0_3 = arith.constant 0 : index
    %c0_4 = arith.constant 0 : index
    %3 = vector.load %arg3[%c0_3, %c0_4] : memref<1x32xf32, #tpu.memory_space<vmem>>, vector<1x32xf32>
    %4 = vector.broadcast %3 : vector<1x32xf32> to vector<8x32xf32>
    %5 = arith.addf %2, %4 : vector<8x32xf32>
    %cst_5 = arith.constant 0.000000e+00 : f32
    %6 = vector.broadcast %cst_5 : f32 to vector<8x32xf32>
    %7 = arith.maximumf %5, %6 : vector<8x32xf32>
    %c0_6 = arith.constant 0 : index
    %c0_7 = arith.constant 0 : index
    %8 = vector.load %arg4[%c0_6, %c0_7] : memref<32x32xf32, #tpu.memory_space<vmem>>, vector<32x32xf32>
    %cst_8 = arith.constant dense<0.000000e+00> : vector<8x32xf32>
    %9 = tpu.matmul %7, %8, %cst_8 {dimension_numbers = #tpu.dot_dimension_numbers<[1], [0], [0], [1], [0, 0, 1, 1], [], []>} : vector<8x32xf32>, vector<32x32xf32>, vector<8x32xf32> -> vector<8x32xf32>
    %c0_9 = arith.constant 0 : index
    %c0_10 = arith.constant 0 : index
    %10 = vector.load %arg5[%c0_9, %c0_10] : memref<1x32xf32, #tpu.memory_space<vmem>>, vector<1x32xf32>
    %11 = vector.broadcast %10 : vector<1x32xf32> to vector<8x32xf32>
    %12 = arith.addf %9, %11 : vector<8x32xf32>
    %cst_11 = arith.constant 0.000000e+00 : f32
    %13 = vector.broadcast %cst_11 : f32 to vector<8x32xf32>
    %14 = arith.maximumf %12, %13 : vector<8x32xf32>
    %c0_12 = arith.constant 0 : index
    %c0_13 = arith.constant 0 : index
    %15 = vector.load %arg6[%c0_12, %c0_13] : memref<32x20xf32, #tpu.memory_space<vmem>>, vector<32x20xf32>
    %cst_14 = arith.constant dense<0.000000e+00> : vector<8x20xf32>
    %16 = tpu.matmul %14, %15, %cst_14 {dimension_numbers = #tpu.dot_dimension_numbers<[1], [0], [0], [1], [0, 0, 1, 1], [], []>} : vector<8x32xf32>, vector<32x20xf32>, vector<8x20xf32> -> vector<8x20xf32>
    %c0_15 = arith.constant 0 : index
    %c0_16 = arith.constant 0 : index
    %17 = vector.load %arg7[%c0_15, %c0_16] : memref<1x20xf32, #tpu.memory_space<vmem>>, vector<1x20xf32>
    %18 = vector.broadcast %17 : vector<1x20xf32> to vector<8x20xf32>
    %19 = arith.addf %16, %18 : vector<8x20xf32>
    %c0_17 = arith.constant 0 : index
    %c0_18 = arith.constant 0 : index
    %20 = vector.load %arg8[%c0_17, %c0_18] : memref<8x20xf32, #tpu.memory_space<vmem>>, vector<8x20xf32>
    tpu.vector_store %arg8[%c0_17, %c0_18], %19 {strides = array<i32>} : memref<8x20xf32, #tpu.memory_space<vmem>>, vector<8x20xf32>,
    return
  }
  func.func @transform_0(%arg0: i32) -> (i32, i32) {
    %c0_i32 = arith.constant 0 : i32
    %c0_i32_0 = arith.constant 0 : i32
    return %arg0, %c0_i32 : i32, i32
  }
  func.func @transform_1(%arg0: i32) -> (i32, i32) {
    %c0_i32 = arith.constant 0 : i32
    %c0_i32_0 = arith.constant 0 : i32
    %c0_i32_1 = arith.constant 0 : i32
    return %c0_i32, %c0_i32_0 : i32, i32
  }
  func.func @transform_2(%arg0: i32) -> (i32, i32) {
    %c0_i32 = arith.constant 0 : i32
    %c0_i32_0 = arith.constant 0 : i32
    %c0_i32_1 = arith.constant 0 : i32
    return %c0_i32, %c0_i32_0 : i32, i32
  }
  func.func @transform_3(%arg0: i32) -> (i32, i32) {
    %c0_i32 = arith.constant 0 : i32
    %c0_i32_0 = arith.constant 0 : i32
    %c0_i32_1 = arith.constant 0 : i32
    return %c0_i32, %c0_i32_0 : i32, i32
  }
  func.func @transform_4(%arg0: i32) -> (i32, i32) {
    %c0_i32 = arith.constant 0 : i32
    %c0_i32_0 = arith.constant 0 : i32
    %c0_i32_1 = arith.constant 0 : i32
    return %c0_i32, %c0_i32_0 : i32, i32
  }
  func.func @transform_5(%arg0: i32) -> (i32, i32) {
    %c0_i32 = arith.constant 0 : i32
    %c0_i32_0 = arith.constant 0 : i32
    %c0_i32_1 = arith.constant 0 : i32
    return %c0_i32, %c0_i32_0 : i32, i32
  }
  func.func @transform_6(%arg0: i32) -> (i32, i32) {
    %c0_i32 = arith.constant 0 : i32
    %c0_i32_0 = arith.constant 0 : i32
    %c0_i32_1 = arith.constant 0 : i32
    return %c0_i32, %c0_i32_0 : i32, i32
  }
  func.func @transform_7(%arg0: i32) -> (i32, i32) {
    %c0_i32 = arith.constant 0 : i32
    %c0_i32_0 = arith.constant 0 : i32
    return %arg0, %c0_i32 : i32, i32
  }
}

</mosaic_0001>

<bundles_post_ra>
// kernel: tpu_custom_call.1
= control target key start
LH: loop header
LB: loop body
LE: loop exit
PB: predicated region body
PF: predicated region fallthrough
CT: control target
= control target key end

     0   :  { %vm34_vm0 = vcmask 130048   ;;  %s260_s0 = inlined_call_operand.vmem [shape: f32[8,16], index: 0, kind: input, shape index: {}]   ;;  %s261_s1 = inlined_call_operand.vmem [shape: f32[16,32], index: 1, kind: input, shape index: {}]   ;;  %s262_s2 = inlined_call_operand.vmem [shape: f32[1,32], index: 2, kind: input, shape index: {}]   ;;  %s263_s3 = inlined_call_operand.vmem [shape: f32[32,32], index: 3, kind: input, shape index: {}]   ;;  %s264_s4 = inlined_call_operand.vmem [shape: f32[1,32], index: 4, kind: input, shape index: {}]   ;;  %s265_s5 = inlined_call_operand.vmem [shape: f32[32,20], index: 5, kind: input, shape index: {}]   ;;  %s266_s6 = inlined_call_operand.vmem [shape: f32[1,20], index: 6, kind: input, shape index: {}]   ;;  %s267_s7 = inlined_call_operand.hbm [shape: f32[8,20], index: 7, kind: output, shape index: {}]  }
   0x1   :  { %v29_v0 = vld [vmem:[%s261_s1 + $0x8] sm:$0xff]  ;;  %v28_v1 = vld [vmem:[%s261_s1] sm:$0xff]  ;;  %v62_v3 = vld [vmem:[%s263_s3 + $0x18] sm:$0xff] }
   0x2   :  { %52 = vmatpush.msra.mxu0 %v29_v0  ;;  %v27_v2 = vld [vmem:[%s260_s0] sm:$0xff]  ;;  %83 = vmatpush.msra.mxu1 %v62_v3 }
   0x3   :  { %12 = vsyncpa [#allocation3], 0  ;;  %v61_v4 = vld [vmem:[%s263_s3 + $0x10] sm:$0xff]  ;;  %v60_v5 = vld [vmem:[%s263_s3 + $0x8] sm:$0xff]  ;;  %vm67_vm1 = vcmask 261120   ;;  %s174_s25 = smov [#allocation2]  }
   0x4   :  { %53 = vmatpush.msra.mxu0 %v28_v1  ;;  %84 = vmatpush.msra.mxu1 %v61_v4  ;;  %v59_v6 = vld [vmem:[%s263_s3] sm:$0xff]  ;;  %v95_v7 = vld [vmem:[%s265_s5 + $0x18] sm:$0xff]  ;;  %v94_v12 = vld [vmem:[%s265_s5 + $0x10] sm:$0xff]  ;;  %s130_s26 = sshll.u32 %s174_s25, 4  ;;  %s132_s29 = sshll.u32 %s267_s7, 4  ;;  %vm123_vm2 = vcmask 162816   ;;  %s131_s26 = int_to_ptr.vmem [resolvable:$true] %s130_s26  ;;  %s133_s29 = int_to_ptr.hbm [resolvable:$true] %s132_s29 }
   0x5   :  { %141 = vmatmul.msk.f32.vlgmr.msra.gmra.mxu0 %vm34_vm0, %v27_v2  ;;  %115 = vmatpush.msra.mxu2 %v95_v7  ;;  %v145_v8 = vld [vmem:[%s262_s2] ss:$0 sm:$0xff]  ;;  %v93_v13 = vld [vmem:[%s265_s5 + $0x8] sm:$0xff] }
   0x6   :  { %85 = vmatpush.msra.mxu1 %v60_v5  ;;  %v92_v14 = vld [vmem:[%s265_s5] sm:$0xff] }
   0x7   :  { %116 = vmatpush.msra.mxu2 %v94_v12  ;;  %v146_v15 = vld [vmem:[%s264_s4] ss:$0 sm:$0xff] }
   0x8   :  { %86 = vmatpush.msra.mxu1 %v59_v6  ;;  %v147_v19 = vld [vmem:[%s266_s6] ss:$0 sm:$0xff] }
   0x9   :  { %117 = vmatpush.msra.mxu2 %v93_v13 }
   0xb   :  { %118 = vmatpush.msra.mxu2 %v92_v14 }
  0x82   :  { %v55_v9 = vpop.f32.mrf.mxu0 }
  0x83   :  { %v56_v10 = vadd.f32 %v145_v8, %v55_v9 }
  0x85   :  { %v58_v11 = vmax.f32 %v56_v10, 0.0 }
  0x87   :  { %142 = vmatmul.msk.f32.vlgmr.msra.gmra.mxu1 %vm67_vm1, %v58_v11 }
 0x104   :  { %v88_v16 = vpop.f32.mrf.mxu1 }
 0x105   :  { %v89_v17 = vadd.f32 %v146_v15, %v88_v16 }
 0x107   :  { %v91_v18 = vmax.f32 %v89_v17, 0.0 }
 0x109   :  { %143 = vmatmul.msk.f32.vlgmr.msra.gmra.mxu2 %vm67_vm1, %v91_v18 }
 0x18c   :  { %v120_v20 = vpop.f32.mrf.mxu2 }
 0x18d   :  { %v121_v21 = vadd.f32 %v147_v19, %v120_v20 }
 0x18f   :  { %124 = vst.msk [vmem:[#allocation2] sm:$0xff] %vm123_vm2, %v121_v21 }
 0x190   :  { %135 = dma.vmem_to_hbm [thread:$0]  %s131_s26, 128, %s133_s29, [#allocation3]  }
 0x191   :  { %172 = dma.done.wait [#allocation3], 128  }
 0x192   :  { %173 = vsyncadd [#allocation3], 4294967168 }
 0x193   :  { %140 = vsyncpa [#allocation3], 1 }

</bundles_post_ra>
